<compile_context>
chip_gen: v5e
topology: v5e:2x2
jax: 0.10.0
libtpu: 0.0.40
codegen_flags: <defaults>
</compile_context>

<pallas_src>
import functools
import math

import jax
import jax.numpy as jnp
from jax import lax
from jax.experimental import pallas as pl
from jax.experimental.pallas import tpu as pltpu


def _round_up(x, m):
    return ((x + m - 1) // m) * m


def _gelu_proj_kernel(x_ref, w_ref, b_ref, o_ref, acc_ref, *, approximate):
    """Fused (x @ W^T + b) followed by GELU, accumulated over the K grid axis.

    x_ref: (tm, tk) activation tile
    w_ref: (tn, tk) weight tile in native nn.Linear (N, K) layout
    b_ref: (1, tn)  bias tile
    """
    k = pl.program_id(2)

    @pl.when(k == 0)
    def _():
        # Fold the bias into the accumulator init (drops the epilogue add).
        acc_ref[...] = jnp.zeros_like(acc_ref) + b_ref[...].astype(jnp.float32)

    # Contract the last dim of both operands: (tm, tk) x (tn, tk) -> (tm, tn).
    # The MXU consumes the RHS transposed; no wrapper-side weight.T needed.
    acc_ref[...] += lax.dot_general(
        x_ref[...],
        w_ref[...],
        dimension_numbers=(((1,), (1,)), ((), ())),
        preferred_element_type=jnp.float32,
    )

    @pl.when(k == pl.num_programs(2) - 1)
    def _():
        z = acc_ref[...]
        if approximate == "tanh":
            # 0.5 * z * (1 + tanh(sqrt(2/pi) * (z + 0.044715 * z^3)))
            c = math.sqrt(2.0 / math.pi)
            g = 0.5 * z * (1.0 + jnp.tanh(c * (z + 0.044715 * z * z * z)))
        else:
            # exact GELU: 0.5 * z * (1 + erf(z / sqrt(2)))
            g = 0.5 * z * (1.0 + lax.erf(z * (1.0 / math.sqrt(2.0))))
        o_ref[...] = g.astype(o_ref.dtype)


def gelu_proj(hidden_states, weight, bias, *, approximate="none",
              tm=256, tn=512, tk=512):
    """Pallas equivalent of GELU.forward: Linear(dim_in, dim_out) + GELU.

    hidden_states: (batch, seq, dim_in)
    weight:        (dim_out, dim_in)   -- PyTorch nn.Linear convention (kept as-is)
    bias:          (dim_out,)
    """
    batch, seq, dim_in = hidden_states.shape
    dim_out = weight.shape[0]

    M, K, N = batch * seq, dim_in, dim_out

    # Clamp tiles to (padded) problem size, keeping hardware alignment:
    # sublane multiples of 8 on M, lane multiples of 128 on N/K.
    tm = min(tm, _round_up(M, 8))
    tn = min(tn, _round_up(N, 128))
    tk = min(tk, _round_up(K, 128))

    # Keep both TensorCores busy on dual-core chips (v7x): make sure the
    # parallel (i, j) grid has at least 2 programs when the problem allows it.
    if pl.cdiv(M, tm) * pl.cdiv(N, tn) == 1:
        if tn > 128:
            tn = _round_up(tn // 2, 128)
        elif tm > 8:
            tm = _round_up(max(tm // 2, 8), 8)

    Mp, Np, Kp = _round_up(M, tm), _round_up(N, tn), _round_up(K, tk)

    x2d = hidden_states.reshape(M, K)
    if (Mp, Kp) != (M, K):
        x2d = jnp.pad(x2d, ((0, Mp - M), (0, Kp - K)))
    w2d = weight
    if (Np, Kp) != (N, K):
        w2d = jnp.pad(w2d, ((0, Np - N), (0, Kp - K)))
    b2d = bias.reshape(1, N)
    if Np != N:
        b2d = jnp.pad(b2d, ((0, 0), (0, Np - N)))

    grid = (Mp // tm, Np // tn, Kp // tk)

    # Double-buffered inputs/output + f32 accumulator + bias, with headroom.
    # Capped at 48 MiB so it stays within v7x's 64 MiB physical VMEM.
    x_isz = jnp.dtype(x2d.dtype).itemsize
    w_isz = jnp.dtype(w2d.dtype).itemsize
    o_isz = jnp.dtype(hidden_states.dtype).itemsize
    est = (2 * (tm * tk * x_isz + tn * tk * w_isz + tm * tn * o_isz)
           + tm * tn * 4 + 2 * tn * 4)
    vmem_limit = min(max(int(est * 1.5), 16 * 1024 * 1024), 48 * 1024 * 1024)

    out2d = pl.pallas_call(
        functools.partial(_gelu_proj_kernel, approximate=approximate),
        out_shape=jax.ShapeDtypeStruct((Mp, Np), hidden_states.dtype),
        grid_spec=pltpu.PrefetchScalarGridSpec(
            num_scalar_prefetch=0,
            grid=grid,
            in_specs=[
                pl.BlockSpec((tm, tk), lambda i, j, k: (i, k)),   # x tile
                pl.BlockSpec((tn, tk), lambda i, j, k: (j, k)),   # W tile (N,K)
                pl.BlockSpec((1, tn), lambda i, j, k: (0, j)),    # bias tile
            ],
            out_specs=pl.BlockSpec((tm, tn), lambda i, j, k: (i, j)),
            scratch_shapes=[pltpu.VMEM((tm, tn), jnp.float32)],
        ),
        compiler_params=pltpu.CompilerParams(
            dimension_semantics=("parallel", "parallel", "arbitrary"),
            vmem_limit_bytes=vmem_limit,
        ),
    )(x2d, w2d, b2d)

    return out2d[:M, :N].reshape(batch, seq, N)


def _reference(hidden_states, weight, bias, approximate="none"):
    z = jnp.einsum("bsk,nk->bsn", hidden_states.astype(jnp.float32),
                   weight.astype(jnp.float32)) + bias.astype(jnp.float32)
    if approximate == "tanh":
        c = math.sqrt(2.0 / math.pi)
        g = 0.5 * z * (1.0 + jnp.tanh(c * (z + 0.044715 * z ** 3)))
    else:
        g = 0.5 * z * (1.0 + lax.erf(z / math.sqrt(2.0)))
    return g.astype(hidden_states.dtype)


if __name__ == "__main__":
    key = jax.random.PRNGKey(0)

    # Case 1: aligned small shapes (batch=2, seq=64, dim_in=128, dim_out=256).
    # Case 2: ragged shapes to exercise the padding/masking path.
    cases = [
        (2, 64, 128, 256, "none"),
        (2, 64, 128, 256, "tanh"),
        (2, 37, 96, 200, "tanh"),
    ]

    for batch, seq, dim_in, dim_out, approx in cases:
        key, kx, kw, kb = jax.random.split(key, 4)
        hidden_states = jax.random.normal(kx, (batch, seq, dim_in), jnp.float32)
        # Deterministic nn.Linear-style parameter init (shapes from __init__).
        bound = 1.0 / math.sqrt(dim_in)
        weight = jax.random.uniform(kw, (dim_out, dim_in), jnp.float32,
                                    -bound, bound)
        bias = jax.random.uniform(kb, (dim_out,), jnp.float32, -bound, bound)

        out = gelu_proj(hidden_states, weight, bias, approximate=approx)
        out = jax.block_until_ready(out)
        ref = _reference(hidden_states, weight, bias, approximate=approx)
        assert out.shape == (batch, seq, dim_out)
        assert jnp.allclose(out, ref, atol=2e-5, rtol=2e-5), (
            f"mismatch for shape={(batch, seq, dim_in, dim_out)}, "
            f"approximate={approx}"
        )

    print("KERNEL_OK")
</pallas_src>

<mosaic_0001>
module attributes {stable_mosaic.version = 11 : i64} {
  func.func @_gelu_proj_kernel(%arg0: i32, %arg1: i32, %arg2: i32, %arg3: memref<128x128xf32, #tpu.memory_space<vmem>>, %arg4: memref<128x128xf32, #tpu.memory_space<vmem>>, %arg5: memref<1x128xf32, #tpu.memory_space<vmem>>, %arg6: memref<128x128xf32, #tpu.memory_space<vmem>>, %arg7: memref<128x128xf32, #tpu.memory_space<vmem>>) attributes {dimension_semantics = [#tpu.dimension_semantics<parallel>, #tpu.dimension_semantics<parallel>, #tpu.dimension_semantics<arbitrary>], iteration_bounds = array<i64: 1, 2, 1>, scalar_prefetch = 0 : i64, scratch_operands = 1 : i64, tpu.core_type = #tpu.core_type<tc>, window_params = [{transform_indices = @transform_0, window_bounds = array<i64: 128, 128>}, {transform_indices = @transform_1, window_bounds = array<i64: 128, 128>}, {transform_indices = @transform_2, window_bounds = array<i64: 1, 128>}, {transform_indices = @transform_3, window_bounds = array<i64: 128, 128>}]} {
    %c0_i32 = arith.constant 0 : i32
    %0 = arith.cmpi eq, %arg2, %c0_i32 : i32
    %1 = arith.extui %0 : i1 to i32
    %c0_i32_0 = arith.constant 0 : i32
    %2 = arith.cmpi ne, %1, %c0_i32_0 : i32
    scf.if %2 {
      %cst_10 = arith.constant 0.000000e+00 : f32
      %12 = vector.broadcast %cst_10 : f32 to vector<128x128xf32>
      %c0_11 = arith.constant 0 : index
      %c0_12 = arith.constant 0 : index
      %13 = vector.load %arg5[%c0_11, %c0_12] : memref<1x128xf32, #tpu.memory_space<vmem>>, vector<1x128xf32>
      %14 = vector.broadcast %13 : vector<1x128xf32> to vector<128x128xf32>
      %15 = arith.addf %12, %14 : vector<128x128xf32>
      %c0_13 = arith.constant 0 : index
      %c0_14 = arith.constant 0 : index
      %16 = vector.load %arg7[%c0_13, %c0_14] : memref<128x128xf32, #tpu.memory_space<vmem>>, vector<128x128xf32>
      tpu.vector_store %arg7[%c0_13, %c0_14], %15 {strides = array<i32>} : memref<128x128xf32, #tpu.memory_space<vmem>>, vector<128x128xf32>,
    } else {
    }
    %c0 = arith.constant 0 : index
    %c0_1 = arith.constant 0 : index
    %3 = vector.load %arg7[%c0, %c0_1] : memref<128x128xf32, #tpu.memory_space<vmem>>, vector<128x128xf32>
    %c0_2 = arith.constant 0 : index
    %c0_3 = arith.constant 0 : index
    %4 = vector.load %arg3[%c0_2, %c0_3] : memref<128x128xf32, #tpu.memory_space<vmem>>, vector<128x128xf32>
    %c0_4 = arith.constant 0 : index
    %c0_5 = arith.constant 0 : index
    %5 = vector.load %arg4[%c0_4, %c0_5] : memref<128x128xf32, #tpu.memory_space<vmem>>, vector<128x128xf32>
    %cst = arith.constant dense<0.000000e+00> : vector<128x128xf32>
    %6 = tpu.matmul %4, %5, %cst {dimension_numbers = #tpu.dot_dimension_numbers<[1], [1], [0], [0], [0, 0, 1, 0], [], []>} : vector<128x128xf32>, vector<128x128xf32>, vector<128x128xf32> -> vector<128x128xf32>
    %7 = arith.addf %3, %6 : vector<128x128xf32>
    %c0_6 = arith.constant 0 : index
    %c0_7 = arith.constant 0 : index
    %8 = vector.load %arg7[%c0_6, %c0_7] : memref<128x128xf32, #tpu.memory_space<vmem>>, vector<128x128xf32>
    tpu.vector_store %arg7[%c0_6, %c0_7], %7 {strides = array<i32>} : memref<128x128xf32, #tpu.memory_space<vmem>>, vector<128x128xf32>,
    %c0_i32_8 = arith.constant 0 : i32
    %9 = arith.cmpi eq, %arg2, %c0_i32_8 : i32
    %10 = arith.extui %9 : i1 to i32
    %c0_i32_9 = arith.constant 0 : i32
    %11 = arith.cmpi ne, %10, %c0_i32_9 : i32
    scf.if %11 {
      %c0_10 = arith.constant 0 : index
      %c0_11 = arith.constant 0 : index
      %12 = vector.load %arg7[%c0_10, %c0_11] : memref<128x128xf32, #tpu.memory_space<vmem>>, vector<128x128xf32>
      %cst_12 = arith.constant 5.000000e-01 : f32
      %13 = vector.broadcast %cst_12 : f32 to vector<128x128xf32>
      %14 = arith.mulf %13, %12 : vector<128x128xf32>
      %cst_13 = arith.constant 0.707106769 : f32
      %15 = vector.broadcast %cst_13 : f32 to vector<128x128xf32>
      %16 = arith.mulf %12, %15 : vector<128x128xf32>
      %17 = math.erf %16 : vector<128x128xf32>
      %cst_14 = arith.constant 1.000000e+00 : f32
      %18 = vector.broadcast %cst_14 : f32 to vector<128x128xf32>
      %19 = arith.addf %18, %17 : vector<128x128xf32>
      %20 = arith.mulf %14, %19 : vector<128x128xf32>
      %c0_15 = arith.constant 0 : index
      %c0_16 = arith.constant 0 : index
      %21 = vector.load %arg6[%c0_15, %c0_16] : memref<128x128xf32, #tpu.memory_space<vmem>>, vector<128x128xf32>
      tpu.vector_store %arg6[%c0_15, %c0_16], %20 {strides = array<i32>} : memref<128x128xf32, #tpu.memory_space<vmem>>, vector<128x128xf32>,
    } else {
    }
    return
  }
  func.func @transform_0(%arg0: i32, %arg1: i32, %arg2: i32) -> (i32, i32) {
    %c0_i32 = arith.constant 0 : i32
    return %arg0, %arg2 : i32, i32
  }
  func.func @transform_1(%arg0: i32, %arg1: i32, %arg2: i32) -> (i32, i32) {
    %c0_i32 = arith.constant 0 : i32
    return %arg1, %arg2 : i32, i32
  }
  func.func @transform_2(%arg0: i32, %arg1: i32, %arg2: i32) -> (i32, i32) {
    %c0_i32 = arith.constant 0 : i32
    %c0_i32_0 = arith.constant 0 : i32
    return %c0_i32, %arg1 : i32, i32
  }
  func.func @transform_3(%arg0: i32, %arg1: i32, %arg2: i32) -> (i32, i32) {
    %c0_i32 = arith.constant 0 : i32
    return %arg0, %arg1 : i32, i32
  }
}

</mosaic_0001>

<bundles_post_ra>
// kernel: tpu_custom_call.1
= control target key start
LH: loop header
LB: loop body
LE: loop exit
PB: predicated region body
PF: predicated region fallthrough
CT: control target
= control target key end

     0   :  { %8 = vsyncpa [#allocation4], 0  ;;  %s2466_s0 = inlined_call_operand.hbm [shape: f32[128,128], index: 0, kind: input, shape index: {}]   ;;  %s2467_s1 = inlined_call_operand.hbm [shape: f32[256,128], index: 1, kind: input, shape index: {}]   ;;  %s2468_s2 = inlined_call_operand.hbm [shape: f32[1,256], index: 2, kind: input, shape index: {}]   ;;  %s2469_s3 = inlined_call_operand.hbm [shape: f32[128,256], index: 3, kind: output, shape index: {}]  }
   0x1   :  { %9 = vsyncpa [#allocation7], 0 }
   0x2   :  { %11 = vsyncpa [#allocation7 + $0x1], 0 }
   0x3   :  { %12 = vsyncpa [#allocation5], 0 }
   0x4   :  { %14 = vsyncpa [#allocation5 + $0x1], 0  ;;  %s1727_s12 = smov 0   ;;  %s1729_s13 = smov 0  }
   0x5   :  { %s1731_s14 = smov 0   ;;  %s1733_s15 = smov 0  }
   0x6   :  { %s1735_s16 = smov 0   ;;  %s1737_s17 = smov 0  }
   0x7 LB: > { %s35_s18 = sadd.s32 1, %s1695_s16  ;;  %s76_s19 = sadd.s32 1, %s1687_s14  ;;  %s1699_s17 = sphi %s1737_s17, %s20_s17   ;;  %s1695_s16 = sphi %s1735_s16, %s2496_s16   ;;  %s1691_s15 = sphi %s1733_s15, %s2495_s15   ;;  %s1687_s14 = sphi %s1731_s14, %s2494_s14   ;;  %s1683_s13 = sphi %s1729_s13, %s2493_s13   ;;  %s1679_s12 = sphi %s1727_s12, %s2492_s12  }
   0x8   : > { %p37_p0 = scmp.ge.s32.totalorder %s35_s18, 2  ;;  %p83_p1 = scmp.ne.s32.totalorder %s1687_s14, %s1683_s13 }
   0x9   : > { %p84_p2 = scmp.eq.s32.totalorder %s1699_s17, 0  ;;  %p1329_p4 = scmp.ge.s32.totalorder %s1699_s17, 2 }
   0xa   : > { %s2498_s18 = smov (%p37_p0, %s35_s18), 0  ;;  %p1432_p6 = scmp.lt.s32.totalorder %s1699_s17, 2 }
   0xb   : > { %p1767_p3 = por %p84_p2, %p83_p1  ;;  %s71_s21 = ssub.s32 %s1695_s16, %s2498_s18 }
   0xc   : > { %p74_p5 = scmp.eq.s32.totalorder %s71_s21, 0  ;;  %s185_s22 = sand.u32 1, %s1699_s17  }
   0xd   : > { %s187_s23 = sand.u32 1, %s1687_s14   ;;  %s1357_s26 = sshll.u32 %s1695_s16, 7 }
   0xe   : > { %s1778_s24 = scalar_select %p74_p5, %s1687_s14, %s76_s19  }
   0xf   : > { %s1330_s25 = sshll.u32 %s187_s23, 7  ;;  %s195_s29 = scalar_lea.hbm %s2467_s1, %s1357_s26 }
  0x10   : > { %s189_s30 = scalar_lea.vmem [#allocation6], %s1330_s25  ;;  %s196_s5 = sshll.u32 %s195_s29, 4  ;;  %s197_s5 = int_to_ptr.hbm [resolvable:$true] %s196_s5 }
  0x11   : > { %s198_s4 = sshll.u32 %s189_s30, 4  ;;  %p1788_p7 = pnand %p1432_p6, %p1767_p3  ;;  %s199_s4 = int_to_ptr.vmem [resolvable:$true] %s198_s4 }
  0x12   : > { %s1792_s7 = scalar_lea.sflag [#allocation7], %s185_s22  ;;  %s1701_s8 = smov 128  }
  0x13   : > { %s1702_s9 = smov 8   ;;  %s1801_s10 = sadd.s32 4294967295, %s1699_s17  }
  0x14   : > { %1423 = dma.hbm_to_vmem [thread:$0]  (!%p1788_p7), %s197_s5, 2048, %s199_s4, %s1792_s7, %s1701_s8, %s1701_s8, %s1702_s9  }
  0x15   : > { %s1326_s11 = sadd.s32 4294967294, %s1699_s17   ;;  %p89_p8 = scmp.ne.s32.totalorder %s1683_s13, %s1679_s12 }
  0x16   : > { %p90_p9 = scmp.eq.s32.totalorder %s1801_s10, 0  ;;  %p141_p10 = scmp.eq.s32.totalorder %s1801_s10, 1 }
  0x17   : > { %p147_p11 = scmp.eq.s32.totalorder %s1326_s11, 1  ;;  %p1327_p12 = scmp.ge.s32.totalorder %s1699_s17, 1 }
  0x18   : > { %p1811_p13 = por %p90_p9, %p89_p8  ;;  %p1818_p0 = por %p141_p10, %p83_p1 }
  0x19   : > { %p1822_p2 = por %p147_p11, %p89_p8  ;;  %p154_p3 = scmp.lt.s32.totalorder %s1699_s17, 3 }
  0x1a   : > { %s169_s26 = sshll.u32 %s2466_s0, 4  ;;  %s1703_s28 = smov [#allocation3]   ;;  %s170_s26 = int_to_ptr.hbm [resolvable:$true] %s169_s26 }
  0x1b   : > { %p1830_p5 = pnand %p1327_p12, %p154_p3  ;;  %s171_s29 = sshll.u32 %s1703_s28, 4  ;;  %s172_s29 = int_to_ptr.vmem [resolvable:$true] %s171_s29 }
  0x1c   : > { %s214_s5 = scalar_lea.hbm %s2468_s2, %s1695_s16  ;;  %s211_s22 = scalar_lea.vmem [#allocation8], %s187_s23 }
  0x1d   : > { %p1416_p1 = pneg %p1830_p5  ;;  %s216_s11 = sshll.u32 %s214_s5, 4  ;;  %s217_s11 = int_to_ptr.hbm [resolvable:$true] %s216_s11 }
  0x1e   : > { %s218_s25 = sshll.u32 %s211_s22, 4  ;;  %227 = sbr.rel (%p1830_p5) target bundleno = 433 (0x1b1), region = 32  ;;  %s219_s25 = int_to_ptr.vmem [resolvable:$true] %s218_s25 }
  0x1f   : > { %p1417_p6 = pnand %p1416_p1, %p90_p9 }
  0x20   : > { %1426 = dma.hbm_to_vmem [thread:$0]  (!%p1788_p7), %s217_s11, 16, %s219_s25, %s1792_s7  }
  0x21   : > { %1419 = dma.hbm_to_vmem [thread:$0]  (!%p1417_p6), %s170_s26, 2048, %s172_s29, [#allocation4], %s1701_s8, %s1701_s8, %s1702_s9  }
  0x23   : > { %1666 = dma.done.wait (%p90_p9), [#allocation4], 2048  }
  0x24   : > { %1668 = vsyncadd (%p90_p9), [#allocation4], 4294965248  ;;  %s234_s23 = sand.u32 1, %s1801_s10   ;;  %s1858_s28 = sand.u32 1, %s1683_s13  }
  0x25   : > { %s1335_s8 = sshll.u32 %s1858_s28, 7  ;;  %s235_s6 = scalar_lea.sflag [#allocation7], %s234_s23 }
  0x26   : > { %s1863_s7 = scalar_lea.vmem [#allocation6], %s1335_s8 }
  0x27   : > { %1670 = dma.done.wait (%p1811_p13), %s235_s6, 2064  }
  0x28   : > { %1672 = vsyncadd (%p1811_p13), %s235_s6, 4294965232  ;;  %v350_v0 = vld [vmem:[%s1863_s7 + $0x78] sm:$0xff]  ;;  %v349_v1 = vld [vmem:[%s1863_s7 + $0x70] sm:$0xff]  ;;  %s247_s9 = scalar_lea.vmem [#allocation8], %s1858_s28  ;;  %s2062_s10 = scalar_lea.vmem [#allocation9], %s1335_s8 }
  0x29   : > { %351 = vmatpush.xpose.msra.mxu0 %v350_v0  ;;  %1358 = vmatpush.xpose.msra.mxu1 %v350_v0  ;;  %v348_v2 = vld [vmem:[%s1863_s7 + $0x68] sm:$0xff]  ;;  %v347_v3 = vld [vmem:[%s1863_s7 + $0x60] sm:$0xff]  ;;  %v346_v4 = vld [vmem:[%s1863_s7 + $0x58] sm:$0xff]  ;;  %s1354_s19 = sshll.u32 %s1691_s15, 3  ;;  %s1202_s30 = sshll.u32 %s2062_s10, 4  ;;  %s1203_s30 = int_to_ptr.vmem [resolvable:$true] %s1202_s30 }
  0x2a   : > { %1359 = vmatpush.xpose.msra.mxu2 %v350_v0  ;;  %1360 = vmatpush.xpose.msra.mxu3 %v350_v0  ;;  %v345_v5 = vld [vmem:[%s1863_s7 + $0x50] sm:$0xff]  ;;  %v344_v6 = vld [vmem:[%s1863_s7 + $0x48] sm:$0xff]  ;;  %v343_v7 = vld [vmem:[%s1863_s7 + $0x40] sm:$0xff]  ;;  %s1201_s29 = scalar_lea.hbm %s2469_s3, %s1354_s19  ;;  %s1188_s15 = scalar_lea.sflag [#allocation5], %s1858_s28 }
  0x2b   : > { %v342_v8 = vld [vmem:[%s1863_s7 + $0x38] sm:$0xff]  ;;  %v341_v9 = vld [vmem:[%s1863_s7 + $0x30] sm:$0xff]  ;;  %v340_v10 = vld [vmem:[%s1863_s7 + $0x28] sm:$0xff]  ;;  %s1204_s4 = sshll.u32 %s1201_s29, 4  ;;  %s1633_s23 = scalar_lea.hbm %s2469_s3, 256  ;;  %s1205_s4 = int_to_ptr.hbm [resolvable:$true] %s1204_s4 }
  0x2c   : > { %v339_v11 = vld [vmem:[%s1863_s7 + $0x20] sm:$0xff]  ;;  %v338_v12 = vld [vmem:[%s1863_s7 + $0x18] sm:$0xff]  ;;  %v337_v13 = vld [vmem:[%s1863_s7 + $0x10] sm:$0xff]  ;;  %s1627_s5 = sshra.s32 %s1205_s4, 4  ;;  %s1628_s5 = int_to_ptr.hbm [resolvable:$true] %s1627_s5 }
  0x2d   : > { %352 = vmatpush.xpose.msra.mxu0 %v349_v1  ;;  %1361 = vmatpush.xpose.msra.mxu1 %v349_v1  ;;  %v336_v14 = vld [vmem:[%s1863_s7 + $0x8] sm:$0xff]  ;;  %v335_v15 = vld [vmem:[%s1863_s7] sm:$0xff]  ;;  %v321_v24 = vld [vmem:[#allocation3 + $0x10] sm:$0xff]  ;;  %s1629_s11 = scalar_lea.hbm %s1628_s5, 128  ;;  %p1634_p10 = scmp.lt.s32.totalorder %s1628_s5, %s2469_s3 }
  0x2e   : > { %1362 = vmatpush.xpose.msra.mxu2 %v349_v1  ;;  %1363 = vmatpush.xpose.msra.mxu3 %v349_v1  ;;  %v319_v16 = vld [vmem:[#allocation3] sm:$0xff]  ;;  %v320_v20 = vld [vmem:[#allocation3 + $0x8] sm:$0xff]  ;;  %v325_v25 = vld [vmem:[#allocation3 + $0x30] sm:$0xff]  ;;  %p1630_p7 = scmp.ne.s32.totalorder %s1628_s5, %s1629_s11  ;;  %p1635_p11 = scmp.lt.s32.totalorder %s1633_s23, %s1629_s11 }
  0x2f   : > { %v323_v17 = vld [vmem:[#allocation3 + $0x20] sm:$0xff]  ;;  %v324_v21 = vld [vmem:[#allocation3 + $0x28] sm:$0xff]  ;;  %v329_v26 = vld [vmem:[#allocation3 + $0x50] sm:$0xff] }
  0x30   : > { %v327_v18 = vld [vmem:[#allocation3 + $0x40] sm:$0xff]  ;;  %v328_v22 = vld [vmem:[#allocation3 + $0x48] sm:$0xff]  ;;  %v333_v27 = vld [vmem:[#allocation3 + $0x70] sm:$0xff]  ;;  %p1631_p8 = pnand %p1630_p7, %p1818_p0  ;;  %p1636_p12 = por %p1635_p11, %p1634_p10 }
  0x31   : > { %353 = vmatpush.xpose.msra.mxu0 %v348_v2  ;;  %1364 = vmatpush.xpose.msra.mxu1 %v348_v2  ;;  %v331_v19 = vld [vmem:[#allocation3 + $0x60] sm:$0xff]  ;;  %v332_v23 = vld [vmem:[#allocation3 + $0x68] sm:$0xff]  ;;  %v322_v28 = vld [vmem:[#allocation3 + $0x18] sm:$0xff] }
  0x32   : > { %1365 = vmatpush.xpose.msra.mxu2 %v348_v2  ;;  %1366 = vmatpush.xpose.msra.mxu3 %v348_v2  ;;  %v326_v29 = vld [vmem:[#allocation3 + $0x38] sm:$0xff]  ;;  %v1888_v32 = vld [vmem:[%s247_s9] ss:$0 sm:$0xff]  ;;  %p1632_p9 = pneg %p1631_p8 }
  0x33   : > { %v330_v30 = vld [vmem:[#allocation3 + $0x58] sm:$0xff] }
  0x34   : > { %v334_v31 = vld [vmem:[#allocation3 + $0x78] sm:$0xff]  ;;  %p1637_p13 = pnand %p1636_p12, %p1632_p9 }
  0x35   : > { %354 = vmatpush.xpose.msra.mxu0 %v347_v3  ;;  %1367 = vmatpush.xpose.msra.mxu1 %v347_v3 }
  0x36   : > { %1368 = vmatpush.xpose.msra.mxu2 %v347_v3  ;;  %1369 = vmatpush.xpose.msra.mxu3 %v347_v3 }
  0x39   : > { %355 = vmatpush.xpose.msra.mxu0 %v346_v4  ;;  %1370 = vmatpush.xpose.msra.mxu1 %v346_v4 }
  0x3a   : > { %1371 = vmatpush.xpose.msra.mxu2 %v346_v4  ;;  %1372 = vmatpush.xpose.msra.mxu3 %v346_v4 }
  0x3d   : > { %356 = vmatpush.xpose.msra.mxu0 %v345_v5  ;;  %1373 = vmatpush.xpose.msra.mxu1 %v345_v5 }
  0x3e   : > { %1374 = vmatpush.xpose.msra.mxu2 %v345_v5  ;;  %1375 = vmatpush.xpose.msra.mxu3 %v345_v5 }
  0x41   : > { %357 = vmatpush.xpose.msra.mxu0 %v344_v6  ;;  %1376 = vmatpush.xpose.msra.mxu1 %v344_v6 }
  0x42   : > { %1377 = vmatpush.xpose.msra.mxu2 %v344_v6  ;;  %1378 = vmatpush.xpose.msra.mxu3 %v344_v6 }
  0x45   : > { %358 = vmatpush.xpose.msra.mxu0 %v343_v7  ;;  %1379 = vmatpush.xpose.msra.mxu1 %v343_v7 }
  0x46   : > { %1380 = vmatpush.xpose.msra.mxu2 %v343_v7  ;;  %1381 = vmatpush.xpose.msra.mxu3 %v343_v7 }
  0x49   : > { %359 = vmatpush.xpose.msra.mxu0 %v342_v8  ;;  %1382 = vmatpush.xpose.msra.mxu1 %v342_v8 }
  0x4a   : > { %1383 = vmatpush.xpose.msra.mxu2 %v342_v8  ;;  %1384 = vmatpush.xpose.msra.mxu3 %v342_v8 }
  0x4d   : > { %360 = vmatpush.xpose.msra.mxu0 %v341_v9  ;;  %1385 = vmatpush.xpose.msra.mxu1 %v341_v9 }
  0x4e   : > { %1386 = vmatpush.xpose.msra.mxu2 %v341_v9  ;;  %1387 = vmatpush.xpose.msra.mxu3 %v341_v9 }
  0x51   : > { %361 = vmatpush.xpose.msra.mxu0 %v340_v10  ;;  %1388 = vmatpush.xpose.msra.mxu1 %v340_v10 }
  0x52   : > { %1389 = vmatpush.xpose.msra.mxu2 %v340_v10  ;;  %1390 = vmatpush.xpose.msra.mxu3 %v340_v10 }
  0x55   : > { %362 = vmatpush.xpose.msra.mxu0 %v339_v11  ;;  %1391 = vmatpush.xpose.msra.mxu1 %v339_v11 }
  0x56   : > { %1392 = vmatpush.xpose.msra.mxu2 %v339_v11  ;;  %1393 = vmatpush.xpose.msra.mxu3 %v339_v11 }
  0x59   : > { %363 = vmatpush.xpose.msra.mxu0 %v338_v12  ;;  %1394 = vmatpush.xpose.msra.mxu1 %v338_v12 }
  0x5a   : > { %1395 = vmatpush.xpose.msra.mxu2 %v338_v12  ;;  %1396 = vmatpush.xpose.msra.mxu3 %v338_v12 }
  0x5d   : > { %364 = vmatpush.xpose.msra.mxu0 %v337_v13  ;;  %1397 = vmatpush.xpose.msra.mxu1 %v337_v13 }
  0x5e   : > { %1398 = vmatpush.xpose.msra.mxu2 %v337_v13  ;;  %1399 = vmatpush.xpose.msra.mxu3 %v337_v13 }
  0x61   : > { %365 = vmatpush.xpose.msra.mxu0 %v336_v14  ;;  %1400 = vmatpush.xpose.msra.mxu1 %v336_v14 }
  0x62   : > { %1401 = vmatpush.xpose.msra.mxu2 %v336_v14  ;;  %1402 = vmatpush.xpose.msra.mxu3 %v336_v14 }
  0x65   : > { %366 = vmatpush.xpose.msra.mxu0 %v335_v15  ;;  %1403 = vmatpush.xpose.msra.mxu1 %v335_v15 }
  0x66   : > { %1404 = vmatpush.xpose.msra.mxu2 %v335_v15  ;;  %1405 = vmatpush.xpose.msra.mxu3 %v335_v15 }
  0x68   : > { %367 = vmatmul.f32.vlgmr.msra.gmra.mxu0 %v319_v16  ;;  %379 = vmatmul.f32.vlgmr.msra.gmra.mxu1 %v323_v17 }
  0x69   : > { %391 = vmatmul.f32.vlgmr.msra.gmra.mxu2 %v327_v18  ;;  %403 = vmatmul.f32.vlgmr.msra.gmra.mxu3 %v331_v19 }
  0x70   : > { %370 = vmatmul.f32.gmra.mxu0 %v320_v20  ;;  %382 = vmatmul.f32.gmra.mxu1 %v324_v21 }
  0x71   : > { %394 = vmatmul.f32.gmra.mxu2 %v328_v22  ;;  %406 = vmatmul.f32.gmra.mxu3 %v332_v23 }
  0x78   : > { %373 = vmatmul.f32.gmra.mxu0 %v321_v24  ;;  %385 = vmatmul.f32.gmra.mxu1 %v325_v25 }
  0x79   : > { %397 = vmatmul.f32.gmra.mxu2 %v329_v26  ;;  %409 = vmatmul.f32.gmra.mxu3 %v333_v27 }
  0x80   : > { %376 = vmatmul.f32.gmra.mxu0 %v322_v28  ;;  %388 = vmatmul.f32.gmra.mxu1 %v326_v29 }
  0x81   : > { %400 = vmatmul.f32.gmra.mxu2 %v330_v30  ;;  %412 = vmatmul.f32.gmra.mxu3 %v334_v31 }
  0xe5   : > { %v368_v33 = vpop.f32.mrf.mxu0  ;;  %v380_v34 = vpop.f32.mrf.mxu1 }
  0xe6   : > { %v1891_v35 = vadd.f32 %v1888_v32, %v368_v33  ;;  %v1894_v36 = vadd.f32 %v1888_v32, %v380_v34 }
  0xe8   : > { %v1897_v37 = vmul.f32 0.70710677, %v1891_v35  ;;  %v1900_v38 = vmul.f32 0.70710677, %v1894_v36 }
  0xea   : > { %v499_v39 = vmul.f32 %v1897_v37, %v1897_v37  ;;  %v659_v40 = vmul.f32 %v1900_v38, %v1900_v38 }
  0xec   : > { %v500_v41 = vmin.f32 %v499_v39, 16.0  ;;  %v1906_v42 = vmin.f32 %v659_v40, 16.0  ;;  %v392_v43 = vpop.f32.mrf.mxu2  ;;  %v404_v44 = vpop.f32.mrf.mxu3 }
  0xed   : > { %v1909_v45 = vadd.f32 %v1888_v32, %v392_v43  ;;  %v1912_v46 = vadd.f32 %v1888_v32, %v404_v44  ;;  %v371_v55 = vpop.f32.mrf.mxu0 }
  0xee   : > { %v501_v47 = vmul.f32 2.1237322e-06, %v500_v41  ;;  %v512_v48 = vmul.f32 3.8918573e-05, %v500_v41  ;;  %v661_v49 = vmul.f32 2.1237322e-06, %v1906_v42  ;;  %v1931_v1 = vadd.f32 %v1888_v32, %v371_v55 }
  0xef   : > { %v672_v50 = vmul.f32 3.8918573e-05, %v1906_v42  ;;  %v1917_v51 = vmul.f32 0.70710677, %v1909_v45  ;;  %v1922_v58 = vmul.f32 0.70710677, %v1912_v46 }
  0xf0   : > { %v502_v52 = vadd.f32 0.00028619796, %v501_v47  ;;  %v513_v53 = vadd.f32 0.001143296, %v512_v48  ;;  %v662_v54 = vadd.f32 0.00028619796, %v661_v49 }
  0xf1   : > { %v673_v56 = vadd.f32 0.001143296, %v672_v50  ;;  %v819_v57 = vmul.f32 %v1917_v51, %v1917_v51  ;;  %v979_v0 = vmul.f32 %v1922_v58, %v1922_v58  ;;  %v1940_v15 = vmul.f32 0.70710677, %v1931_v1 }
  0xf2   : > { %v503_v59 = vmul.f32 %v502_v52, %v500_v41  ;;  %v514_v60 = vmul.f32 %v513_v53, %v500_v41  ;;  %v663_v61 = vmul.f32 %v662_v54, %v1906_v42 }
  0xf3   : > { %v674_v62 = vmul.f32 %v673_v56, %v1906_v42  ;;  %v1926_v63 = vmin.f32 %v819_v57, 16.0  ;;  %v1936_v11 = vmin.f32 %v979_v0, 16.0  ;;  %v539_v57 = vmul.f32 %v1940_v15, %v1940_v15 }
  0xf4   : > { %v504_v2 = vadd.f32 0.0036580483, %v503_v59  ;;  %v515_v3 = vadd.f32 0.014752088, %v514_v60  ;;  %v664_v4 = vadd.f32 0.0036580483, %v663_v61 }
  0xf5   : > { %v675_v5 = vadd.f32 0.014752088, %v674_v62  ;;  %v821_v6 = vmul.f32 2.1237322e-06, %v1926_v63  ;;  %v832_v7 = vmul.f32 3.8918573e-05, %v1926_v63  ;;  %v383_v62 = vpop.f32.mrf.mxu1 }
  0xf6   : > { %v505_v8 = vmul.f32 %v504_v2, %v500_v41  ;;  %v516_v9 = vmul.f32 %v515_v3, %v500_v41  ;;  %v665_v10 = vmul.f32 %v664_v4, %v1906_v42  ;;  %v981_v22 = vmul.f32 2.1237322e-06, %v1936_v11  ;;  %v395_v3 = vpop.f32.mrf.mxu2 }
  0xf7   : > { %v676_v12 = vmul.f32 %v675_v5, %v1906_v42  ;;  %v822_v13 = vadd.f32 0.00028619796, %v821_v6  ;;  %v833_v14 = vadd.f32 0.001143296, %v832_v7  ;;  %v992_v26 = vmul.f32 3.8918573e-05, %v1936_v11 }
  0xf8   : > { %v506_v16 = vadd.f32 0.05243302, %v505_v8  ;;  %v517_v17 = vadd.f32 0.112945676, %v516_v9  ;;  %v666_v18 = vadd.f32 0.05243302, %v665_v10  ;;  %v1978_v9 = vadd.f32 %v1888_v32, %v383_v62 }
  0xf9   : > { %v677_v19 = vadd.f32 0.112945676, %v676_v12  ;;  %v823_v20 = vmul.f32 %v822_v13, %v1926_v63  ;;  %v834_v21 = vmul.f32 %v833_v14, %v1926_v63  ;;  %v982_v30 = vadd.f32 0.00028619796, %v981_v22 }
  0xfa   : > { %v507_v23 = vmul.f32 %v506_v16, %v500_v41  ;;  %v518_v24 = vmul.f32 %v517_v17, %v500_v41  ;;  %v667_v25 = vmul.f32 %v666_v18, %v1906_v42  ;;  %v993_v50 = vadd.f32 0.001143296, %v992_v26 }
  0xfb   : > { %v678_v27 = vmul.f32 %v677_v19, %v1906_v42  ;;  %v824_v28 = vadd.f32 0.0036580483, %v823_v20  ;;  %v835_v29 = vadd.f32 0.014752088, %v834_v21  ;;  %v983_v44 = vmul.f32 %v982_v30, %v1936_v11 }
  0xfc   : > { %v508_v31 = vadd.f32 0.18741608, %v507_v23  ;;  %v519_v33 = vadd.f32 0.4994258, %v518_v24  ;;  %v668_v34 = vadd.f32 0.18741608, %v667_v25  ;;  %v994_v2 = vmul.f32 %v993_v50, %v1936_v11 }
  0xfd   : > { %v679_v39 = vadd.f32 0.4994258, %v678_v27  ;;  %v825_v40 = vmul.f32 %v824_v28, %v1926_v63  ;;  %v836_v43 = vmul.f32 %v835_v29, %v1926_v63  ;;  %v984_v55 = vadd.f32 0.0036580483, %v983_v44 }
  0xfe   : > { %v509_v47 = vmul.f32 %v508_v31, %v500_v41  ;;  %v520_v48 = vmul.f32 %v519_v33, %v500_v41  ;;  %v669_v49 = vmul.f32 %v668_v34, %v1906_v42  ;;  %v1963_v0 = vmul.f32 0.5, %v1891_v35 }
  0xff   : > { %v680_v52 = vmul.f32 %v679_v39, %v1906_v42  ;;  %v826_v53 = vadd.f32 0.05243302, %v825_v40  ;;  %v837_v54 = vadd.f32 0.112945676, %v836_v43  ;;  %v985_v41 = vmul.f32 %v984_v55, %v1936_v11 }
 0x100   : > { %v1953_v56 = vadd.f32 1.0, %v520_v48  ;;  %v510_v42 = vadd.f32 1.1283791, %v509_v47  ;;  %v1968_v4 = vmul.f32 0.5, %v1894_v36  ;;  %v670_v5 = vadd.f32 1.1283791, %v669_v49 }
 0x101   : > { %v1957_v59 = vadd.f32 1.0, %v680_v52  ;;  %v827_v60 = vmul.f32 %v826_v53, %v1926_v63  ;;  %v838_v61 = vmul.f32 %v837_v54, %v1926_v63  ;;  %v1972_v6 = vmul.f32 0.5, %v1909_v45 }
 0x102   : > { %1490 = vrcp.f32 %v1953_v56  ;;  %v533_v7 = vand.u32 2147483648, %v1953_v56  ;;  %v1975_v35 = vmin.f32 %v539_v57, 16.0  ;;  %v531_v10 = vand.u32 2147483647, %v1953_v56 }
 0x103   : > { %1492 = vrcp.f32 %v1957_v59  ;;  %v828_v8 = vadd.f32 0.18741608, %v827_v60  ;;  %v839_v12 = vadd.f32 0.4994258, %v838_v61  ;;  %v986_v13 = vadd.f32 0.05243302, %v985_v41 }
 0x104   : > { %v1982_v36 = vadd.f32 %v1888_v32, %v395_v3  ;;  %v511_v14 = vmul.f32 %v510_v42, %v1897_v37  ;;  %v691_v45 = vand.u32 2147483647, %v1957_v59  ;;  %v995_v17 = vadd.f32 0.014752088, %v994_v2 }
 0x105   : > { %v829_v16 = vmul.f32 %v828_v8, %v1926_v63  ;;  %vm527_vm0 = vweird.f32 %v1953_v56  ;;  %v671_v18 = vmul.f32 %v670_v5, %v1900_v38  ;;  %v693_v19 = vand.u32 2147483648, %v1957_v59 }
 0x106   : > { %v840_v20 = vmul.f32 %v839_v12, %v1926_v63  ;;  %v534_v22 = vor.u32 1.1754944e-38, %v533_v7  ;;  %vm687_vm1 = vweird.f32 %v1957_v59  ;;  %v987_v23 = vmul.f32 %v986_v13, %v1936_v11 }
 0x107   : > { %v996_v37 = vmul.f32 %v995_v17, %v1936_v11  ;;  %vm1995_vm2 = vcmp.eq.f32.partialorder %v531_v10, 8.507059e+37  ;;  %v541_v27 = vmul.f32 2.1237322e-06, %v1975_v35  ;;  %v552_v63 = vmul.f32 3.8918573e-05, %v1975_v35 }
 0x108   : > { %v1491_v21 = vpop.eup %1490  ;;  %v1999_v38 = vadd.f32 1.0, %v840_v20  ;;  %vm2004_vm3 = vcmp.eq.f32.partialorder %v691_v45, 8.507059e+37  ;;  %v830_v30 = vadd.f32 1.1283791, %v829_v16  ;;  %v694_v34 = vor.u32 1.1754944e-38, %v693_v19 }
 0x109   : > { %v1493_v24 = vpop.eup %1492  ;;  %v523_v25 = vmul.f32 %v1491_v21, %v1953_v56  ;;  %v997_v31 = vadd.f32 0.112945676, %v996_v37  ;;  %v2010_v39 = vmul.f32 0.70710677, %v1978_v9  ;;  %vm528_vm4 = vweird.f32 %v1491_v21 }
 0x10a   : > { %v683_v28 = vmul.f32 %v1493_v24, %v1957_v59  ;;  %1494 = vrcp.f32 %v1999_v38  ;;  %v2014_v44 = vmul.f32 0.70710677, %v1982_v36  ;;  %v988_v48 = vadd.f32 0.18741608, %v987_v23  ;;  %vm529_vm6 = vmor %vm527_vm0, %vm528_vm4 }
 0x10b   : > { %v524_v33 = vsub.f32 1.0, %v523_v25  ;;  %v998_v43 = vmul.f32 %v997_v31, %v1936_v11  ;;  %v542_v49 = vadd.f32 0.00028619796, %v541_v27  ;;  %v553_v50 = vadd.f32 0.001143296, %v552_v63 }
 0x10c   : > { %v684_v40 = vsub.f32 1.0, %v683_v28  ;;  %vm688_vm5 = vweird.f32 %v1493_v24  ;;  %v831_v53 = vmul.f32 %v830_v30, %v1917_v51  ;;  %v699_v61 = vmul.f32 %v2010_v39, %v2010_v39 }
 0x10d   : > { %v525_v47 = vmul.f32 %v1491_v21, %v524_v33  ;;  %v999_v54 = vadd.f32 0.4994258, %v998_v43  ;;  %v543_v57 = vmul.f32 %v542_v49, %v1975_v35  ;;  %v554_v60 = vmul.f32 %v553_v50, %v1975_v35  ;;  %vm689_vm8 = vmor %vm687_vm1, %vm688_vm5 }
 0x10e   : > { %v685_v52 = vmul.f32 %v1493_v24, %v684_v40  ;;  %vm847_vm7 = vweird.f32 %v1999_v38  ;;  %v851_v62 = vand.u32 2147483647, %v1999_v38  ;;  %v2029_v7 = vmin.f32 %v699_v61, 16.0 }
 0x10f   : > { %v526_v55 = vadd.f32 %v1491_v21, %v525_v47  ;;  %v1000_v51 = vmul.f32 %v999_v54, %v1936_v11  ;;  %v544_v3 = vadd.f32 0.0036580483, %v543_v57  ;;  %v555_v5 = vadd.f32 0.014752088, %v554_v60 }
 0x110   : > { %v686_v41 = vadd.f32 %v1493_v24, %v685_v52  ;;  %v1495_v42 = vpop.eup %1494  ;;  %v853_v12 = vand.u32 2147483648, %v1999_v38  ;;  %v989_v23 = vmul.f32 %v988_v48, %v1936_v11  ;;  %vm2046_vm10 = vcmp.eq.f32.partialorder %v851_v62, 8.507059e+37 }
 0x111   : > { %v530_v2 = vsel %vm529_vm6, %v1491_v21, %v526_v55  ;;  %v843_v10 = vmul.f32 %v1495_v42, %v1999_v38  ;;  %v2037_v16 = vadd.f32 1.0, %v1000_v51  ;;  %v545_v59 = vmul.f32 %v544_v3, %v1975_v35 }
 0x112   : > { %v535_v56 = vsel %vm1995_vm2, %v534_v22, %v530_v2  ;;  %v690_v8 = vsel %vm689_vm8, %v1493_v24, %v686_v41  ;;  %v556_v20 = vmul.f32 %v555_v5, %v1975_v35  ;;  %v701_v21 = vmul.f32 2.1237322e-06, %v2029_v7  ;;  %v407_v5 = vpop.f32.mrf.mxu3 }
 0x113   : > { %v536_v13 = vmul.f32 %v535_v56, %v511_v14  ;;  %v695_v45 = vsel %vm2004_vm3, %v694_v34, %v690_v8  ;;  %v844_v19 = vsub.f32 1.0, %v843_v10  ;;  %1496 = vrcp.f32 %v2037_v16 }
 0x114   : > { %v696_v17 = vmul.f32 %v695_v45, %v671_v18  ;;  %v859_v14 = vmul.f32 %v2014_v44, %v2014_v44  ;;  %vm848_vm9 = vweird.f32 %v1495_v42  ;;  %v546_v25 = vadd.f32 0.05243302, %v545_v59 }
 0x115   : > { %v1337_v22 = vclamps-f32 %v536_v13, 1.0  ;;  %v845_v24 = vmul.f32 %v1495_v42, %v844_v19  ;;  %v557_v27 = vadd.f32 0.112945676, %v556_v20  ;;  %v702_v63 = vadd.f32 0.00028619796, %v701_v21  ;;  %vm849_vm11 = vmor %vm847_vm7, %vm848_vm9 }
 0x116   : > { %v1341_v37 = vclamps-f32 %v696_v17, 1.0  ;;  %v854_v11 = vor.u32 1.1754944e-38, %v853_v12  ;;  %v547_v30 = vmul.f32 %v546_v25, %v1975_v35  ;;  %v712_v40 = vmul.f32 3.8918573e-05, %v2029_v7 }
 0x117   : > { %v1139_v26 = vadd.f32 1.0, %v1337_v22  ;;  %v846_v29 = vadd.f32 %v1495_v42, %v845_v24  ;;  %v558_v33 = vmul.f32 %v557_v27, %v1975_v35  ;;  %v703_v34 = vmul.f32 %v702_v63, %v2029_v7  ;;  %v374_v27 = vpop.f32.mrf.mxu0 }
 0x118   : > { %v1143_v28 = vadd.f32 1.0, %v1341_v37  ;;  %v548_v48 = vadd.f32 0.18741608, %v547_v30  ;;  %v2058_v49 = vmin.f32 %v859_v14, 16.0  ;;  %v713_v54 = vadd.f32 0.001143296, %v712_v40 }
 0x119   : > { %v1155_v31 = vmul.f32 %v1139_v26, %v1963_v0  ;;  %v850_v47 = vsel %vm849_vm11, %v1495_v42, %v846_v29  ;;  %v1497_v50 = vpop.eup %1496  ;;  %v559_v38 = vadd.f32 0.4994258, %v558_v33  ;;  %v704_v52 = vadd.f32 0.0036580483, %v703_v34 }
 0x11a   : > { %v1159_v43 = vmul.f32 %v1143_v28, %v1968_v4  ;;  %v855_v0 = vsel %vm2046_vm10, %v854_v11, %v850_v47  ;;  %v990_v4 = vadd.f32 1.1283791, %v989_v23  ;;  %v1003_v57 = vmul.f32 %v1497_v50, %v2037_v16 }
 0x11b   : > { %1171 = vst [vmem:[%s2062_s10] sm:$0xff] %v1155_v31  ;;  %v856_v55 = vmul.f32 %v855_v0, %v831_v53  ;;  %v1011_v60 = vand.u32 2147483647, %v2037_v16  ;;  %v560_v61 = vmul.f32 %v559_v38, %v1975_v35  ;;  %v705_v41 = vmul.f32 %v704_v52, %v2029_v7 }
 0x11c   : > { %1175 = vst [vmem:[%s2062_s10 + $0x20] sm:$0xff] %v1159_v43  ;;  %v714_v62 = vmul.f32 %v713_v54, %v2029_v7  ;;  %v861_v51 = vmul.f32 2.1237322e-06, %v2058_v49  ;;  %v1004_v2 = vsub.f32 1.0, %v1003_v57  ;;  %vm1008_vm12 = vweird.f32 %v1497_v50 }
 0x11d   : > { %v1345_v42 = vclamps-f32 %v856_v55, 1.0  ;;  %v1013_v3 = vand.u32 2147483648, %v2037_v16  ;;  %v549_v53 = vmul.f32 %v548_v48, %v1975_v35  ;;  %v2076_v56 = vadd.f32 1.0, %v560_v61 }
 0x11e   : > { %v715_v8 = vadd.f32 0.014752088, %v714_v62  ;;  %v872_v10 = vmul.f32 3.8918573e-05, %v2058_v49  ;;  %v1005_v13 = vmul.f32 %v1497_v50, %v1004_v2  ;;  %v706_v45 = vadd.f32 0.05243302, %v705_v41 }
 0x11f   : > { %v1147_v12 = vadd.f32 1.0, %v1345_v42  ;;  %v862_v59 = vadd.f32 0.00028619796, %v861_v51  ;;  %v991_v17 = vmul.f32 %v990_v4, %v1922_v58  ;;  %1498 = vrcp.f32 %v2076_v56  ;;  %v386_v42 = vpop.f32.mrf.mxu1 }
 0x120   : > { %v2082_v19 = vadd.f32 %v1888_v32, %v407_v5  ;;  %v1006_v35 = vadd.f32 %v1497_v50, %v1005_v13  ;;  %vm1007_vm13 = vweird.f32 %v2037_v16  ;;  %v716_v21 = vmul.f32 %v715_v8, %v2029_v7 }
 0x121   : > { %v1163_v20 = vmul.f32 %v1147_v12, %v1972_v6  ;;  %vm1009_vm14 = vmor %vm1007_vm13, %vm1008_vm12  ;;  %v1014_v22 = vor.u32 1.1754944e-38, %v1013_v3  ;;  %v550_v23 = vadd.f32 1.1283791, %v549_v53  ;;  %v863_v14 = vmul.f32 %v862_v59, %v2058_v49 }
 0x122   : > { %v873_v37 = vadd.f32 0.001143296, %v872_v10  ;;  %v1010_v58 = vsel %vm1009_vm14, %v1497_v50, %v1006_v35  ;;  %vm1012_vm15 = vcmp.eq.f32.partialorder %v1011_v60, 8.507059e+37  ;;  %v707_v24 = vmul.f32 %v706_v45, %v2029_v7 }
 0x123   : > { %1179 = vst [vmem:[%s2062_s10 + $0x40] sm:$0xff] %v1163_v20  ;;  %v717_v25 = vadd.f32 0.112945676, %v716_v21  ;;  %v1015_v26 = vsel %vm1012_vm15, %v1014_v22, %v1010_v58  ;;  %v864_v6 = vadd.f32 0.0036580483, %v863_v14  ;;  %v479_v63 = vmul.f32 0.5, %v1912_v46 }
 0x124   : > { %v874_v18 = vmul.f32 %v873_v37, %v2058_v49  ;;  %v2093_v16 = vmul.f32 0.70710677, %v2082_v19  ;;  %v1016_v28 = vmul.f32 %v1015_v26, %v991_v17  ;;  %v551_v30 = vmul.f32 %v550_v23, %v1940_v15 }
 0x125   : > { %v718_v29 = vmul.f32 %v717_v25, %v2029_v7  ;;  %v1499_v11 = vpop.eup %1498  ;;  %v865_v31 = vmul.f32 %v864_v6, %v2058_v49  ;;  %v571_v47 = vand.u32 2147483647, %v2076_v56  ;;  %v2104_v48 = vadd.f32 %v1888_v32, %v374_v27 }
 0x126   : > { %v875_v33 = vadd.f32 0.014752088, %v874_v18  ;;  %v1019_v34 = vmul.f32 %v2093_v16, %v2093_v16  ;;  %v1349_v40 = vclamps-f32 %v1016_v28, 1.0  ;;  %v563_v43 = vmul.f32 %v1499_v11, %v2076_v56 }
 0x127   : > { %v708_v46 = vadd.f32 0.18741608, %v707_v24  ;;  %v719_v50 = vadd.f32 0.4994258, %v718_v29  ;;  %v573_v54 = vand.u32 2147483648, %v2076_v56  ;;  %vm568_vm0 = vweird.f32 %v1499_v11 }
 0x128   : > { %v876_v0 = vmul.f32 %v875_v33, %v2058_v49  ;;  %v2107_v38 = vmin.f32 %v1019_v34, 16.0  ;;  %v1151_v15 = vadd.f32 1.0, %v1349_v40  ;;  %v564_v52 = vsub.f32 1.0, %v563_v43 }
 0x129   : > { %v866_v55 = vadd.f32 0.05243302, %v865_v31  ;;  %v720_v4 = vmul.f32 %v719_v50, %v2029_v7  ;;  %v2114_v51 = vmul.f32 0.70710677, %v2104_v48  ;;  %v709_v2 = vmul.f32 %v708_v46, %v2029_v7 }
 0x12a   : > { %v877_v57 = vadd.f32 0.112945676, %v876_v0  ;;  %v1021_v60 = vmul.f32 2.1237322e-06, %v2107_v38  ;;  %v1167_v61 = vmul.f32 %v1151_v15, %v479_v63  ;;  %v565_v41 = vmul.f32 %v1499_v11, %v564_v52  ;;  %v398_v52 = vpop.f32.mrf.mxu2 }
 0x12b   : > { %v1032_v62 = vmul.f32 3.8918573e-05, %v2107_v38  ;;  %v2117_v3 = vadd.f32 1.0, %v720_v4  ;;  %vm567_vm1 = vweird.f32 %v2076_v56  ;;  %v867_v10 = vmul.f32 %v866_v55, %v2058_v49 }
 0x12c   : > { %v878_v5 = vmul.f32 %v877_v57, %v2058_v49  ;;  %v1022_v53 = vadd.f32 0.00028619796, %v1021_v60  ;;  %1183 = vst [vmem:[%s2062_s10 + $0x60] sm:$0xff] %v1167_v61  ;;  %v566_v8 = vadd.f32 %v1499_v11, %v565_v41  ;;  %vm569_vm2 = vmor %vm567_vm1, %vm568_vm0  ;;  %v574_v13 = vor.u32 1.1754944e-38, %v573_v54 }
 0x12d   : > { %v1033_v12 = vadd.f32 0.001143296, %v1032_v62  ;;  %1500 = vrcp.f32 %v2117_v3  ;;  %v579_v7 = vmul.f32 %v2114_v51, %v2114_v51  ;;  %v2128_v45 = vadd.f32 %v1888_v32, %v386_v42 }
 0x12e   : > { %v570_v59 = vsel %vm569_vm2, %v1499_v11, %v566_v8  ;;  %vm572_vm3 = vcmp.eq.f32.partialorder %v571_v47, 8.507059e+37  ;;  %v879_v17 = vadd.f32 0.4994258, %v878_v5  ;;  %v1023_v20 = vmul.f32 %v1022_v53, %v2107_v38 }
 0x12f   : > { %v468_v56 = vmul.f32 0.5, %v1931_v1  ;;  %v575_v35 = vsel %vm572_vm3, %v574_v13, %v570_v59  ;;  %v710_v21 = vadd.f32 1.1283791, %v709_v2  ;;  %v1034_v22 = vmul.f32 %v1033_v12, %v2107_v38 }
 0x130   : > { %v576_v23 = vmul.f32 %v575_v35, %v551_v30  ;;  %v868_v14 = vadd.f32 0.18741608, %v867_v10  ;;  %v880_v37 = vmul.f32 %v879_v17, %v2058_v49  ;;  %v1024_v58 = vadd.f32 0.0036580483, %v1023_v20 }
 0x131   : > { %v2135_v24 = vmul.f32 0.5, %v1978_v9  ;;  %v1035_v25 = vadd.f32 0.014752088, %v1034_v22  ;;  %v2137_v26 = vmin.f32 %v579_v7, 16.0  ;;  %v2140_v6 = vmul.f32 0.70710677, %v2128_v45 }
 0x132   : > { %v1338_v18 = vclamps-f32 %v576_v23, 1.0  ;;  %v731_v1 = vand.u32 2147483647, %v2117_v3  ;;  %v2143_v27 = vadd.f32 1.0, %v880_v37  ;;  %v1025_v63 = vmul.f32 %v1024_v58, %v2107_v38 }
 0x133   : > { %v1501_v28 = vpop.eup %1500  ;;  %v733_v29 = vand.u32 2147483648, %v2117_v3  ;;  %v1036_v11 = vmul.f32 %v1035_v25, %v2107_v38  ;;  %v581_v9 = vmul.f32 2.1237322e-06, %v2137_v26  ;;  %v592_v30 = vmul.f32 3.8918573e-05, %v2137_v26 }
 0x134   : > { %v1140_v31 = vadd.f32 1.0, %v1338_v18  ;;  %v723_v33 = vmul.f32 %v1501_v28, %v2117_v3  ;;  %1502 = vrcp.f32 %v2143_v27  ;;  %v739_v34 = vmul.f32 %v2140_v6, %v2140_v6 }
 0x135   : > { %v711_v40 = vmul.f32 %v710_v21, %v2010_v39  ;;  %vm727_vm4 = vweird.f32 %v2117_v3  ;;  %v869_v43 = vmul.f32 %v868_v14, %v2058_v49  ;;  %v1026_v47 = vadd.f32 0.05243302, %v1025_v63 }
 0x136   : > { %v1156_v46 = vmul.f32 %v1140_v31, %v468_v56  ;;  %v724_v50 = vsub.f32 1.0, %v723_v33  ;;  %v1037_v0 = vadd.f32 0.112945676, %v1036_v11  ;;  %v582_v15 = vadd.f32 0.00028619796, %v581_v9 }
 0x137   : > { %vm728_vm5 = vweird.f32 %v1501_v28  ;;  %vm2157_vm6 = vcmp.eq.f32.partialorder %v731_v1, 8.507059e+37  ;;  %v734_v55 = vor.u32 1.1754944e-38, %v733_v29  ;;  %v593_v4 = vadd.f32 0.001143296, %v592_v30 }
 0x138   : > { %1172 = vst [vmem:[%s2062_s10 + $0x8] sm:$0xff] %v1156_v46  ;;  %v725_v57 = vmul.f32 %v1501_v28, %v724_v50  ;;  %v1038_v39 = vmul.f32 %v1037_v0, %v2107_v38  ;;  %v583_v60 = vmul.f32 %v582_v15, %v2137_v26  ;;  %v2164_v49 = vmin.f32 %v739_v34, 16.0  ;;  %vm729_vm7 = vmor %vm727_vm4, %vm728_vm5 }
 0x139   : > { %v870_v61 = vadd.f32 1.1283791, %v869_v43  ;;  %v1027_v41 = vmul.f32 %v1026_v47, %v2107_v38  ;;  %v594_v62 = vmul.f32 %v593_v4, %v2137_v26  ;;  %v2169_v42 = vadd.f32 %v1888_v32, %v398_v52 }
 0x13a   : > { %v1503_v2 = vpop.eup %1502  ;;  %v726_v5 = vadd.f32 %v1501_v28, %v725_v57  ;;  %v1039_v53 = vadd.f32 0.4994258, %v1038_v39  ;;  %v584_v8 = vadd.f32 0.0036580483, %v583_v60  ;;  %v741_v10 = vmul.f32 2.1237322e-06, %v2164_v49 }
 0x13b   : > { %v883_v12 = vmul.f32 %v1503_v2, %v2143_v27  ;;  %v891_v13 = vand.u32 2147483647, %v2143_v27  ;;  %v893_v7 = vand.u32 2147483648, %v2143_v27  ;;  %v595_v59 = vadd.f32 0.014752088, %v594_v62 }
 0x13c   : > { %v730_v17 = vsel %vm729_vm7, %v1501_v28, %v726_v5  ;;  %v1040_v20 = vmul.f32 %v1039_v53, %v2107_v38  ;;  %v585_v56 = vmul.f32 %v584_v8, %v2137_v26  ;;  %v742_v35 = vadd.f32 0.00028619796, %v741_v10 }
 0x13d   : > { %v735_v21 = vsel %vm2157_vm6, %v734_v55, %v730_v17  ;;  %v884_v22 = vsub.f32 1.0, %v883_v12  ;;  %v1028_v23 = vadd.f32 0.18741608, %v1027_v41  ;;  %v596_v3 = vmul.f32 %v595_v59, %v2137_v26 }
 0x13e   : > { %v736_v14 = vmul.f32 %v735_v21, %v711_v40  ;;  %v2183_v37 = vadd.f32 1.0, %v1040_v20  ;;  %v586_v58 = vadd.f32 0.05243302, %v585_v56  ;;  %v743_v25 = vmul.f32 %v742_v35, %v2164_v49 }
 0x13f   : > { %v885_v18 = vmul.f32 %v1503_v2, %v884_v22  ;;  %vm888_vm8 = vweird.f32 %v1503_v2  ;;  %v597_v1 = vadd.f32 0.112945676, %v596_v3  ;;  %v752_v63 = vmul.f32 3.8918573e-05, %v2164_v49 }
 0x140   : > { %v1342_v28 = vclamps-f32 %v736_v14, 1.0  ;;  %v871_v29 = vmul.f32 %v870_v61, %v2014_v44  ;;  %vm887_vm9 = vweird.f32 %v2143_v27  ;;  %1504 = vrcp.f32 %v2183_v37 }
 0x141   : > { %v886_v11 = vadd.f32 %v1503_v2, %v885_v18  ;;  %v894_v9 = vor.u32 1.1754944e-38, %v893_v7  ;;  %v598_v30 = vmul.f32 %v597_v1, %v2137_v26  ;;  %v2192_v31 = vmul.f32 0.70710677, %v2169_v42  ;;  %vm889_vm10 = vmor %vm887_vm9, %vm888_vm8 }
 0x142   : > { %v1144_v33 = vadd.f32 1.0, %v1342_v28  ;;  %v587_v34 = vmul.f32 %v586_v58, %v2137_v26  ;;  %v744_v40 = vadd.f32 0.0036580483, %v743_v25  ;;  %v753_v43 = vadd.f32 0.001143296, %v752_v63 }
 0x143   : > { %v890_v47 = vsel %vm889_vm10, %v1503_v2, %v886_v11  ;;  %vm892_vm11 = vcmp.eq.f32.partialorder %v891_v13, 8.507059e+37  ;;  %v1029_v44 = vmul.f32 %v1028_v23, %v2107_v38  ;;  %v599_v27 = vadd.f32 0.4994258, %v598_v30 }
 0x144   : > { %v1160_v46 = vmul.f32 %v1144_v33, %v2135_v24  ;;  %v895_v50 = vsel %vm892_vm11, %v894_v9, %v890_v47  ;;  %v1051_v0 = vand.u32 2147483647, %v2183_v37  ;;  %v754_v15 = vmul.f32 %v753_v43, %v2164_v49  ;;  %v410_v24 = vpop.f32.mrf.mxu3 }
 0x145   : > { %v896_v52 = vmul.f32 %v895_v50, %v871_v29  ;;  %v600_v54 = vmul.f32 %v599_v27, %v2137_v26  ;;  %v745_v55 = vmul.f32 %v744_v40, %v2164_v49  ;;  %v899_v4 = vmul.f32 %v2192_v31, %v2192_v31 }
 0x146   : > { %v1505_v57 = vpop.eup %1504  ;;  %1176 = vst [vmem:[%s2062_s10 + $0x28] sm:$0xff] %v1160_v46  ;;  %v476_v38 = vmul.f32 0.5, %v1982_v36  ;;  %v588_v39 = vadd.f32 0.18741608, %v587_v34  ;;  %v755_v60 = vadd.f32 0.014752088, %v754_v15  ;;  %v2216_v7 = vadd.f32 %v1888_v32, %v410_v24 }
 0x147   : > { %v1346_v61 = vclamps-f32 %v896_v52, 1.0  ;;  %v2206_v41 = vmul.f32 0.5, %v2082_v19  ;;  %v1030_v62 = vadd.f32 1.1283791, %v1029_v44  ;;  %v1043_v2 = vmul.f32 %v1505_v57, %v2183_v37  ;;  %v377_v19 = vpop.f32.mrf.mxu0 }
 0x148   : > { %v1053_v5 = vand.u32 2147483648, %v2183_v37  ;;  %v2210_v53 = vadd.f32 1.0, %v600_v54  ;;  %v756_v8 = vmul.f32 %v755_v60, %v2164_v49  ;;  %v2213_v10 = vmin.f32 %v899_v4, 16.0 }
 0x149   : > { %v1148_v12 = vadd.f32 1.0, %v1346_v61  ;;  %v1044_v36 = vsub.f32 1.0, %v1043_v2  ;;  %v746_v13 = vadd.f32 0.05243302, %v745_v55  ;;  %vm1047_vm12 = vweird.f32 %v2183_v37 }
 0x14a   : > { %vm2219_vm13 = vcmp.eq.f32.partialorder %v1051_v0, 8.507059e+37  ;;  %v589_v17 = vmul.f32 %v588_v39, %v2137_v26  ;;  %1506 = vrcp.f32 %v2210_v53  ;;  %vm1048_vm14 = vweird.f32 %v1505_v57 }
 0x14b   : > { %v1164_v20 = vmul.f32 %v1148_v12, %v476_v38  ;;  %v1045_v56 = vmul.f32 %v1505_v57, %v1044_v36  ;;  %v757_v35 = vadd.f32 0.112945676, %v756_v8  ;;  %v1054_v21 = vor.u32 1.1754944e-38, %v1053_v5  ;;  %vm1049_vm15 = vmor %vm1047_vm12, %vm1048_vm14 }
 0x14c   : > { %v901_v22 = vmul.f32 2.1237322e-06, %v2213_v10  ;;  %v912_v23 = vmul.f32 3.8918573e-05, %v2213_v10  ;;  %v2228_v3 = vadd.f32 %v1888_v32, %v377_v19  ;;  %v747_v58 = vmul.f32 %v746_v13, %v2164_v49 }
 0x14d   : > { %1180 = vst [vmem:[%s2062_s10 + $0x48] sm:$0xff] %v1164_v20  ;;  %v1046_v14 = vadd.f32 %v1505_v57, %v1045_v56  ;;  %v758_v26 = vmul.f32 %v757_v35, %v2164_v49  ;;  %v2234_v25 = vmul.f32 0.70710677, %v2216_v7  ;;  %v1031_v18 = vmul.f32 %v1030_v62, %v2093_v16 }
 0x14e   : > { %v590_v1 = vadd.f32 1.1283791, %v589_v17  ;;  %v902_v63 = vadd.f32 0.00028619796, %v901_v22  ;;  %v913_v28 = vadd.f32 0.001143296, %v912_v23  ;;  %vm607_vm1 = vweird.f32 %v2210_v53 }
 0x14f   : > { %v1050_v29 = vsel %vm1049_vm15, %v1505_v57, %v1046_v14  ;;  %v611_v11 = vand.u32 2147483647, %v2210_v53  ;;  %v759_v9 = vadd.f32 0.4994258, %v758_v26  ;;  %v1059_v30 = vmul.f32 %v2234_v25, %v2234_v25 }
 0x150   : > { %v1507_v33 = vpop.eup %1506  ;;  %v1055_v34 = vsel %vm2219_vm13, %v1054_v21, %v1050_v29  ;;  %v903_v40 = vmul.f32 %v902_v63, %v2213_v10  ;;  %v914_v16 = vmul.f32 %v913_v28, %v2213_v10  ;;  %v2247_v37 = vmul.f32 0.70710677, %v2228_v3  ;;  %v389_v21 = vpop.f32.mrf.mxu1 }
 0x151   : > { %v1056_v43 = vmul.f32 %v1055_v34, %v1031_v18  ;;  %v603_v47 = vmul.f32 %v1507_v33, %v2210_v53  ;;  %v613_v44 = vand.u32 2147483648, %v2210_v53  ;;  %v748_v27 = vadd.f32 0.18741608, %v747_v58 }
 0x152   : > { %v760_v46 = vmul.f32 %v759_v9, %v2164_v49  ;;  %v904_v50 = vadd.f32 0.0036580483, %v903_v40  ;;  %v915_v0 = vadd.f32 0.014752088, %v914_v16  ;;  %v2252_v15 = vmin.f32 %v1059_v30, 16.0 }
 0x153   : > { %v1350_v52 = vclamps-f32 %v1056_v43, 1.0  ;;  %v604_v54 = vsub.f32 1.0, %v603_v47  ;;  %vm608_vm0 = vweird.f32 %v1507_v33  ;;  %v619_v55 = vmul.f32 %v2247_v37, %v2247_v37 }
 0x154   : > { %v2256_v4 = vadd.f32 1.0, %v760_v46  ;;  %v905_v57 = vmul.f32 %v904_v50, %v2213_v10  ;;  %v916_v38 = vmul.f32 %v915_v0, %v2213_v10  ;;  %v1061_v39 = vmul.f32 2.1237322e-06, %v2252_v15  ;;  %vm609_vm3 = vmor %vm607_vm1, %vm608_vm0 }
 0x155   : > { %v1152_v60 = vadd.f32 1.0, %v1350_v52  ;;  %v605_v24 = vmul.f32 %v1507_v33, %v604_v54  ;;  %v1072_v61 = vmul.f32 3.8918573e-05, %v2252_v15  ;;  %v2262_v62 = vmin.f32 %v619_v55, 16.0  ;;  %v401_v54 = vpop.f32.mrf.mxu2 }
 0x156   : > { %v591_v2 = vmul.f32 %v590_v1, %v2114_v51  ;;  %vm2266_vm2 = vcmp.eq.f32.partialorder %v611_v11, 8.507059e+37  ;;  %1508 = vrcp.f32 %v2256_v4  ;;  %v906_v36 = vadd.f32 0.05243302, %v905_v57 }
 0x157   : > { %v1168_v8 = vmul.f32 %v1152_v60, %v2206_v41  ;;  %v606_v12 = vadd.f32 %v1507_v33, %v605_v24  ;;  %v917_v13 = vadd.f32 0.112945676, %v916_v38  ;;  %v614_v19 = vor.u32 1.1754944e-38, %v613_v44 }
 0x158   : > { %v749_v59 = vmul.f32 %v748_v27, %v2164_v49  ;;  %v1062_v17 = vadd.f32 0.00028619796, %v1061_v39  ;;  %v1073_v51 = vadd.f32 0.001143296, %v1072_v61  ;;  %v907_v20 = vmul.f32 %v906_v36, %v2213_v10 }
 0x159   : > { %1184 = vst [vmem:[%s2062_s10 + $0x68] sm:$0xff] %v1168_v8  ;;  %v610_v53 = vsel %vm609_vm3, %v1507_v33, %v606_v12  ;;  %v918_v56 = vmul.f32 %v917_v13, %v2213_v10  ;;  %v621_v35 = vmul.f32 2.1237322e-06, %v2262_v62  ;;  %v632_v49 = vmul.f32 3.8918573e-05, %v2262_v62 }
 0x15a   : > { %v615_v41 = vsel %vm2266_vm2, %v614_v19, %v610_v53  ;;  %v1063_v22 = vmul.f32 %v1062_v17, %v2252_v15  ;;  %v1074_v23 = vmul.f32 %v1073_v51, %v2252_v15  ;;  %v469_v14 = vmul.f32 0.5, %v2104_v48 }
 0x15b   : > { %v616_v58 = vmul.f32 %v615_v41, %v591_v2  ;;  %v919_v26 = vadd.f32 0.4994258, %v918_v56  ;;  %v622_v18 = vadd.f32 0.00028619796, %v621_v35  ;;  %v633_v29 = vadd.f32 0.001143296, %v632_v49 }
 0x15c   : > { %v1509_v1 = vpop.eup %1508  ;;  %v1064_v63 = vadd.f32 0.0036580483, %v1063_v22  ;;  %v1075_v28 = vadd.f32 0.014752088, %v1074_v23  ;;  %v2285_v11 = vadd.f32 %v1888_v32, %v389_v21  ;;  %v750_v30 = vadd.f32 1.1283791, %v749_v59 }
 0x15d   : > { %v1339_v9 = vclamps-f32 %v616_v58, 1.0  ;;  %v763_v33 = vmul.f32 %v1509_v1, %v2256_v4  ;;  %v908_v34 = vadd.f32 0.18741608, %v907_v20  ;;  %v920_v40 = vmul.f32 %v919_v26, %v2213_v10  ;;  %v1522_v2 = vld [vmem:[%s247_s9] ss:$0 sm:$0xff] }
 0x15e   : > { %v1065_v16 = vmul.f32 %v1064_v63, %v2252_v15  ;;  %v1076_v48 = vmul.f32 %v1075_v28, %v2252_v15  ;;  %v623_v43 = vmul.f32 %v622_v18, %v2262_v62  ;;  %v771_v27 = vand.u32 2147483647, %v2256_v4 }
 0x15f   : > { %v1141_v47 = vadd.f32 1.0, %v1339_v9  ;;  %v764_v44 = vsub.f32 1.0, %v763_v33  ;;  %v773_v32 = vand.u32 2147483648, %v2256_v4  ;;  %v2294_v46 = vadd.f32 1.0, %v920_v40 }
 0x160   : > { %v1066_v50 = vadd.f32 0.05243302, %v1065_v16  ;;  %v1077_v0 = vadd.f32 0.112945676, %v1076_v48  ;;  %v634_v52 = vmul.f32 %v633_v29, %v2262_v62  ;;  %vm768_vm4 = vweird.f32 %v1509_v1 }
 0x161   : > { %v1157_v55 = vmul.f32 %v1141_v47, %v469_v14  ;;  %v765_v57 = vmul.f32 %v1509_v1, %v764_v44  ;;  %v624_v38 = vadd.f32 0.0036580483, %v623_v43  ;;  %vm767_vm5 = vweird.f32 %v2256_v4  ;;  %v413_v47 = vpop.f32.mrf.mxu3 }
 0x162   : > { %v909_v39 = vmul.f32 %v908_v34, %v2213_v10  ;;  %1510 = vrcp.f32 %v2294_v46  ;;  %v1067_v24 = vmul.f32 %v1066_v50, %v2252_v15  ;;  %v1078_v61 = vmul.f32 %v1077_v0, %v2252_v15  ;;  %vm769_vm6 = vmor %vm767_vm5, %vm768_vm4 }
 0x163   : > { %1173 = vst [vmem:[%s2062_s10 + $0x10] sm:$0xff] %v1157_v55  ;;  %v766_v60 = vadd.f32 %v1509_v1, %v765_v57  ;;  %v2305_v5 = vadd.f32 %v1522_v2, %v401_v54  ;;  %v774_v8 = vor.u32 1.1754944e-38, %v773_v32  ;;  %v625_v12 = vmul.f32 %v624_v38, %v2262_v62 }
 0x164   : > { %v635_v36 = vadd.f32 0.014752088, %v634_v52  ;;  %v2309_v4 = vmul.f32 0.70710677, %v2285_v11  ;;  %v751_v10 = vmul.f32 %v750_v30, %v2140_v6  ;;  %vm772_vm7 = vcmp.eq.f32.partialorder %v771_v27, 8.507059e+37 }
 0x165   : > { %v770_v13 = vsel %vm769_vm6, %v1509_v1, %v766_v60  ;;  %v1079_v19 = vadd.f32 0.4994258, %v1078_v61  ;;  %v910_v17 = vadd.f32 1.1283791, %v909_v39  ;;  %v1068_v56 = vadd.f32 0.18741608, %v1067_v24 }
 0x166   : > { %v775_v59 = vsel %vm772_vm7, %v774_v8, %v770_v13  ;;  %v636_v51 = vmul.f32 %v635_v36, %v2262_v62  ;;  %v779_v53 = vmul.f32 %v2309_v4, %v2309_v4  ;;  %v2317_v21 = vmul.f32 0.70710677, %v2305_v5 }
 0x167   : > { %v776_v20 = vmul.f32 %v775_v59, %v751_v10  ;;  %v1080_v35 = vmul.f32 %v1079_v19, %v2252_v15  ;;  %v473_v6 = vmul.f32 0.5, %v2128_v45  ;;  %v626_v22 = vadd.f32 0.05243302, %v625_v12 }
 0x168   : > { %v1511_v41 = vpop.eup %1510  ;;  %v637_v23 = vadd.f32 0.112945676, %v636_v51  ;;  %v2320_v49 = vmin.f32 %v779_v53, 16.0  ;;  %v2323_v58 = vmul.f32 0.5, %v2169_v42  ;;  %v931_v18 = vand.u32 2147483647, %v2294_v46 }
 0x169   : > { %v1343_v14 = vclamps-f32 %v776_v20, 1.0  ;;  %v923_v26 = vmul.f32 %v1511_v41, %v2294_v46  ;;  %v933_v1 = vand.u32 2147483648, %v2294_v46  ;;  %v2328_v63 = vadd.f32 1.0, %v1080_v35 }
 0x16a   : > { %v638_v28 = vmul.f32 %v637_v23, %v2262_v62  ;;  %v781_v45 = vmul.f32 2.1237322e-06, %v2320_v49  ;;  %v792_v30 = vmul.f32 3.8918573e-05, %v2320_v49  ;;  %v939_v42 = vmul.f32 %v2317_v21, %v2317_v21 }
 0x16b   : > { %v1145_v29 = vadd.f32 1.0, %v1343_v14  ;;  %v924_v9 = vsub.f32 1.0, %v923_v26  ;;  %v911_v33 = vmul.f32 %v910_v17, %v2192_v31  ;;  %v1069_v34 = vmul.f32 %v1068_v56, %v2252_v15 }
 0x16c   : > { %1512 = vrcp.f32 %v2328_v63  ;;  %v627_v40 = vmul.f32 %v626_v22, %v2262_v62  ;;  %vm928_vm8 = vweird.f32 %v1511_v41  ;;  %v639_v43 = vadd.f32 0.4994258, %v638_v28 }
 0x16d   : > { %v1161_v16 = vmul.f32 %v1145_v29, %v473_v6  ;;  %v925_v48 = vmul.f32 %v1511_v41, %v924_v9  ;;  %vm927_vm9 = vweird.f32 %v2294_v46  ;;  %vm2340_vm10 = vcmp.eq.f32.partialorder %v931_v18, 8.507059e+37 }
 0x16e   : > { %v782_v27 = vadd.f32 0.00028619796, %v781_v45  ;;  %v793_v32 = vadd.f32 0.001143296, %v792_v30  ;;  %v934_v15 = vor.u32 1.1754944e-38, %v933_v1  ;;  %v640_v50 = vmul.f32 %v639_v43, %v2262_v62  ;;  %vm929_vm11 = vmor %vm927_vm9, %vm928_vm8 }
 0x16f   : > { %1177 = vst [vmem:[%s2062_s10 + $0x30] sm:$0xff] %v1161_v16  ;;  %v926_v31 = vadd.f32 %v1511_v41, %v925_v48  ;;  %v2346_v0 = vmin.f32 %v939_v42, 16.0  ;;  %v1070_v52 = vadd.f32 1.1283791, %v1069_v34  ;;  %v2350_v46 = vadd.f32 %v1522_v2, %v413_v47 }
 0x170   : > { %v783_v54 = vmul.f32 %v782_v27, %v2320_v49  ;;  %v794_v55 = vmul.f32 %v793_v32, %v2320_v49  ;;  %v628_v38 = vadd.f32 0.18741608, %v627_v40  ;;  %v2352_v39 = vadd.f32 1.0, %v640_v50 }
 0x171   : > { %v930_v57 = vsel %vm929_vm11, %v1511_v41, %v926_v31  ;;  %v941_v60 = vmul.f32 2.1237322e-06, %v2346_v0  ;;  %v952_v36 = vmul.f32 3.8918573e-05, %v2346_v0  ;;  %v2359_v13 = vmul.f32 0.5, %v2216_v7 }
 0x172   : > { %v1513_v24 = vpop.eup %1512  ;;  %v935_v61 = vsel %vm2340_vm10, %v934_v15, %v930_v57  ;;  %v784_v8 = vadd.f32 0.0036580483, %v783_v54  ;;  %v795_v12 = vadd.f32 0.014752088, %v794_v55  ;;  %1514 = vrcp.f32 %v2352_v39 }
 0x173   : > { %v936_v10 = vmul.f32 %v935_v61, %v911_v33  ;;  %v1083_v2 = vmul.f32 %v1513_v24, %v2328_v63  ;;  %v1071_v19 = vmul.f32 %v1070_v52, %v2234_v25  ;;  %v1091_v59 = vand.u32 2147483647, %v2328_v63 }
 0x174   : > { %v1093_v17 = vand.u32 2147483648, %v2328_v63  ;;  %v2367_v51 = vmul.f32 0.70710677, %v2350_v46  ;;  %v796_v56 = vmul.f32 %v795_v12, %v2320_v49  ;;  %v942_v35 = vadd.f32 0.00028619796, %v941_v60 }
 0x175   : > { %v1347_v53 = vclamps-f32 %v936_v10, 1.0  ;;  %v1084_v20 = vsub.f32 1.0, %v1083_v2  ;;  %vm1088_vm12 = vweird.f32 %v1513_v24  ;;  %v629_v7 = vmul.f32 %v628_v38, %v2262_v62 }
 0x176   : > { %v785_v41 = vmul.f32 %v784_v8, %v2320_v49  ;;  %v953_v6 = vadd.f32 0.001143296, %v952_v36  ;;  %v797_v23 = vadd.f32 0.112945676, %v796_v56  ;;  %v943_v14 = vmul.f32 %v942_v35, %v2346_v0 }
 0x177   : > { %v1149_v22 = vadd.f32 1.0, %v1347_v53  ;;  %v1085_v25 = vmul.f32 %v1513_v24, %v1084_v20  ;;  %vm1087_vm13 = vweird.f32 %v2328_v63  ;;  %vm2374_vm14 = vcmp.eq.f32.partialorder %v1091_v59, 8.507059e+37 }
 0x178   : > { %v954_v18 = vmul.f32 %v953_v6, %v2346_v0  ;;  %v1099_v62 = vmul.f32 %v2367_v51, %v2367_v51  ;;  %v1515_v1 = vpop.eup %1514  ;;  %v1094_v29 = vor.u32 1.1754944e-38, %v1093_v17  ;;  %v798_v9 = vmul.f32 %v797_v23, %v2320_v49  ;;  %vm1089_vm15 = vmor %vm1087_vm13, %vm1088_vm12 }
 0x179   : > { %v1165_v28 = vmul.f32 %v1149_v22, %v2323_v58  ;;  %v1086_v45 = vadd.f32 %v1513_v24, %v1085_v25  ;;  %v630_v30 = vadd.f32 1.1283791, %v629_v7  ;;  %v643_v63 = vmul.f32 %v1515_v1, %v2352_v39 }
 0x17a   : > { %v786_v42 = vadd.f32 0.05243302, %v785_v41  ;;  %v955_v33 = vadd.f32 0.014752088, %v954_v18  ;;  %v799_v40 = vadd.f32 0.4994258, %v798_v9  ;;  %vm648_vm0 = vweird.f32 %v1515_v1 }
 0x17b   : > { %1181 = vst [vmem:[%s2062_s10 + $0x50] sm:$0xff] %v1165_v28  ;;  %v1090_v34 = vsel %vm1089_vm15, %v1513_v24, %v1086_v45  ;;  %v944_v16 = vadd.f32 0.0036580483, %v943_v14  ;;  %v2386_v48 = vmin.f32 %v1099_v62, 16.0  ;;  %v644_v43 = vsub.f32 1.0, %v643_v63 }
 0x17c   : > { %v1095_v58 = vsel %vm2374_vm14, %v1094_v29, %v1090_v34  ;;  %v651_v47 = vand.u32 2147483647, %v2352_v39  ;;  %v956_v44 = vmul.f32 %v955_v33, %v2346_v0  ;;  %v653_v32 = vand.u32 2147483648, %v2352_v39 }
 0x17d   : > { %v1096_v27 = vmul.f32 %v1095_v58, %v1071_v19  ;;  %v800_v31 = vmul.f32 %v799_v40, %v2320_v49  ;;  %v645_v15 = vmul.f32 %v1515_v1, %v644_v43  ;;  %v1101_v52 = vmul.f32 2.1237322e-06, %v2386_v48 }
 0x17e   : > { %v957_v50 = vadd.f32 0.112945676, %v956_v44  ;;  %v1112_v54 = vmul.f32 3.8918573e-05, %v2386_v48  ;;  %v787_v57 = vmul.f32 %v786_v42, %v2320_v49  ;;  %v945_v60 = vmul.f32 %v944_v16, %v2346_v0 }
 0x17f   : > { %v1351_v55 = vclamps-f32 %v1096_v27, 1.0  ;;  %v801_v38 = vadd.f32 1.0, %v800_v31  ;;  %v631_v24 = vmul.f32 %v630_v30, %v2247_v37  ;;  %v646_v61 = vadd.f32 %v1515_v1, %v645_v15 }
 0x180   : > { %vm647_vm1 = vweird.f32 %v2352_v39  ;;  %v958_v8 = vmul.f32 %v957_v50, %v2346_v0  ;;  %v654_v36 = vor.u32 1.1754944e-38, %v653_v32  ;;  %v1113_v10 = vadd.f32 0.001143296, %v1112_v54 }
 0x181   : > { %v1153_v12 = vadd.f32 1.0, %v1351_v55  ;;  %vm649_vm2 = vmor %vm647_vm1, %vm648_vm0  ;;  %1516 = vrcp.f32 %v801_v38  ;;  %vm652_vm3 = vcmp.eq.f32.partialorder %v651_v47, 8.507059e+37  ;;  %v1102_v59 = vadd.f32 0.00028619796, %v1101_v52 }
 0x182   : > { %v650_v2 = vsel %vm649_vm2, %v1515_v1, %v646_v61  ;;  %v959_v19 = vadd.f32 0.4994258, %v958_v8  ;;  %v788_v37 = vadd.f32 0.18741608, %v787_v57  ;;  %v946_v20 = vadd.f32 0.05243302, %v945_v60 }
 0x183   : > { %v1169_v17 = vmul.f32 %v1153_v12, %v2359_v13  ;;  %v655_v53 = vsel %vm652_vm3, %v654_v36, %v650_v2  ;;  %v1114_v35 = vmul.f32 %v1113_v10, %v2386_v48  ;;  %v1103_v6 = vmul.f32 %v1102_v59, %v2386_v48 }
 0x184   : > { %v656_v56 = vmul.f32 %v655_v53, %v631_v24  ;;  %v960_v39 = vmul.f32 %v959_v19, %v2346_v0  ;;  %v789_v25 = vmul.f32 %v788_v37, %v2320_v49  ;;  %v947_v23 = vmul.f32 %v946_v20, %v2346_v0 }
 0x185   : > { %1185 = vst [vmem:[%s2062_s10 + $0x70] sm:$0xff] %v1169_v17  ;;  %v1115_v13 = vadd.f32 0.014752088, %v1114_v35  ;;  %v470_v14 = vmul.f32 0.5, %v2228_v3  ;;  %v1104_v28 = vadd.f32 0.0036580483, %v1103_v6  ;;  %vm807_vm5 = vweird.f32 %v801_v38 }
 0x186   : > { %v1340_v7 = vclamps-f32 %v656_v56, 1.0  ;;  %v961_v41 = vadd.f32 1.0, %v960_v39  ;;  %v790_v29 = vadd.f32 1.1283791, %v789_v25  ;;  %v813_v9 = vand.u32 2147483648, %v801_v38 }
 0x187   : > { %v1517_v22 = vpop.eup %1516  ;;  %v1116_v45 = vmul.f32 %v1115_v13, %v2386_v48  ;;  %v948_v30 = vadd.f32 0.18741608, %v947_v23  ;;  %v811_v49 = vand.u32 2147483647, %v801_v38  ;;  %v1105_v3 = vmul.f32 %v1104_v28, %v2386_v48 }
 0x188   : > { %v1142_v26 = vadd.f32 1.0, %v1340_v7  ;;  %v803_v18 = vmul.f32 %v1517_v22, %v801_v38  ;;  %1518 = vrcp.f32 %v961_v41  ;;  %vm808_vm4 = vweird.f32 %v1517_v22 }
 0x189   : > { %v1117_v42 = vadd.f32 0.112945676, %v1116_v45  ;;  %vm809_vm6 = vmor %vm807_vm5, %vm808_vm4  ;;  %v814_v16 = vor.u32 1.1754944e-38, %v813_v9  ;;  %v949_v58 = vmul.f32 %v948_v30, %v2346_v0  ;;  %v791_v43 = vmul.f32 %v790_v29, %v2309_v4 }
 0x18a   : > { %v1158_v62 = vmul.f32 %v1142_v26, %v470_v14  ;;  %v804_v1 = vsub.f32 1.0, %v803_v18  ;;  %vm812_vm7 = vcmp.eq.f32.partialorder %v811_v49, 8.507059e+37  ;;  %v1106_v50 = vadd.f32 0.05243302, %v1105_v3 }
 0x18b   : > { %v1118_v34 = vmul.f32 %v1117_v42, %v2386_v48  ;;  %v950_v52 = vadd.f32 1.1283791, %v949_v58  ;;  %v973_v54 = vand.u32 2147483648, %v961_v41  ;;  %v971_v60 = vand.u32 2147483647, %v961_v41 }
 0x18c   : > { %1174 = vst [vmem:[%s2062_s10 + $0x18] sm:$0xff] %v1158_v62  ;;  %v805_v63 = vmul.f32 %v1517_v22, %v804_v1  ;;  %v474_v0 = vmul.f32 0.5, %v2285_v11  ;;  %vm967_vm9 = vweird.f32 %v961_v41  ;;  %v1107_v8 = vmul.f32 %v1106_v50, %v2386_v48 }
 0x18d   : > { %v1119_v32 = vadd.f32 0.4994258, %v1118_v34  ;;  %v974_v12 = vor.u32 1.1754944e-38, %v973_v54  ;;  %v951_v10 = vmul.f32 %v950_v52, %v2317_v21  ;;  %vm972_vm11 = vcmp.eq.f32.partialorder %v971_v60, 8.507059e+37 }
 0x18e   : > { %v806_v33 = vadd.f32 %v1517_v22, %v805_v63  ;;  %v1519_v40 = vpop.eup %1518  ;;  %v1108_v17 = vadd.f32 0.18741608, %v1107_v8  ;;  %v478_v37 = vmul.f32 0.5, %v2305_v5  ;;  %v482_v18 = vmul.f32 0.5, %v2350_v46 }
 0x18f   : > { %v963_v44 = vmul.f32 %v1519_v40, %v961_v41  ;;  %v1120_v55 = vmul.f32 %v1119_v32, %v2386_v48  ;;  %vm968_vm8 = vweird.f32 %v1519_v40 }
 0x190   : > { %v810_v47 = vsel %vm809_vm6, %v1517_v22, %v806_v33  ;;  %vm969_vm10 = vmor %vm967_vm9, %vm968_vm8  ;;  %v1109_v56 = vmul.f32 %v1108_v17, %v2386_v48 }
 0x191   : > { %v815_v27 = vsel %vm812_vm7, %v814_v16, %v810_v47  ;;  %v964_v15 = vsub.f32 1.0, %v963_v44  ;;  %v1121_v4 = vadd.f32 1.0, %v1120_v55 }
 0x192   : > { %v816_v31 = vmul.f32 %v815_v27, %v791_v43  ;;  %v1110_v21 = vadd.f32 1.1283791, %v1109_v56 }
 0x193   : > { %v965_v38 = vmul.f32 %v1519_v40, %v964_v15  ;;  %1520 = vrcp.f32 %v1121_v4  ;;  %v1133_v41 = vand.u32 2147483648, %v1121_v4  ;;  %v1131_v22 = vand.u32 2147483647, %v1121_v4 }
 0x194   : > { %v1344_v57 = vclamps-f32 %v816_v31, 1.0  ;;  %vm1127_vm13 = vweird.f32 %v1121_v4  ;;  %v1111_v5 = vmul.f32 %v1110_v21, %v2367_v51 }
 0x195   : > { %v966_v61 = vadd.f32 %v1519_v40, %v965_v38  ;;  %v1134_v23 = vor.u32 1.1754944e-38, %v1133_v41  ;;  %vm1132_vm15 = vcmp.eq.f32.partialorder %v1131_v22, 8.507059e+37 }
 0x196   : > { %v1146_v24 = vadd.f32 1.0, %v1344_v57 }
 0x197   : > { %v970_v2 = vsel %vm969_vm10, %v1519_v40, %v966_v61 }
 0x198   : > { %v1162_v36 = vmul.f32 %v1146_v24, %v474_v0  ;;  %v975_v19 = vsel %vm972_vm11, %v974_v12, %v970_v2 }
 0x199   : > { %v976_v59 = vmul.f32 %v975_v19, %v951_v10  ;;  %v1521_v53 = vpop.eup %1520 }
 0x19a   : > { %1178 = vst [vmem:[%s2062_s10 + $0x38] sm:$0xff] %v1162_v36  ;;  %v1123_v39 = vmul.f32 %v1521_v53, %v1121_v4  ;;  %vm1128_vm12 = vweird.f32 %v1521_v53 }
 0x19b   : > { %v1348_v11 = vclamps-f32 %v976_v59, 1.0  ;;  %vm1129_vm14 = vmor %vm1127_vm13, %vm1128_vm12 }
 0x19c   : > { %v1124_v7 = vsub.f32 1.0, %v1123_v39 }
 0x19d   : > { %v1150_v20 = vadd.f32 1.0, %v1348_v11 }
 0x19e   : > { %v1125_v6 = vmul.f32 %v1521_v53, %v1124_v7 }
 0x19f   : > { %v1166_v35 = vmul.f32 %v1150_v20, %v478_v37 }
 0x1a0   : > { %v1126_v25 = vadd.f32 %v1521_v53, %v1125_v6 }
 0x1a1   : > { %1182 = vst [vmem:[%s2062_s10 + $0x58] sm:$0xff] %v1166_v35 }
 0x1a2   : > { %v1130_v48 = vsel %vm1129_vm14, %v1521_v53, %v1126_v25 }
 0x1a3   : > { %v1135_v13 = vsel %vm1132_vm15, %v1134_v23, %v1130_v48 }
 0x1a4   : > { %v1136_v14 = vmul.f32 %v1135_v13, %v1111_v5 }
 0x1a6   : > { %v1352_v26 = vclamps-f32 %v1136_v14, 1.0 }
 0x1a8   : > { %v1154_v62 = vadd.f32 1.0, %v1352_v26 }
 0x1aa   : > { %v1170_v1 = vmul.f32 %v1154_v62, %v482_v18 }
 0x1ac   : > { %1186 = vst [vmem:[%s2062_s10 + $0x78] sm:$0xff] %v1170_v1 }
 0x1ad   : > { %1640 = shalt.err (!%p1637_p13)
}
 0x1ae   : > { %s1704_s28 = smov 128   ;;  %s1705_s7 = smov 256  }
 0x1af   : > { %s1706_s9 = smov 8  }
 0x1b0   : > { %1414 = dma.vmem_to_hbm [thread:$0]  (%p1818_p0), %s1203_s30, 2048, %s1205_s4, %s1188_s15, %s1704_s28, %s1705_s7, %s1706_s9  }
 0x1b1 PF: > { %s1219_s10 = sand.u32 1, %s1679_s12   ;;  %p1428_p3 = pnand %p1329_p4, %p1822_p2 }
 0x1b2   : > { %s1220_s19 = scalar_lea.sflag [#allocation5], %s1219_s10 }
 0x1b3   : > { %p1429_p5 = pneg %p1428_p3 }
 0x1b5   : > { %1674 = dma.done.wait (%p1429_p5), %s1220_s19, 2048  }
 0x1b6   : > { %1676 = vsyncadd (%p1429_p5), %s1220_s19, 4294965248  ;;  %s20_s17 = sadd.s32 1, %s1699_s17   ;;  %s2492_s12 = smov %s1683_s13 }
 0x1b7   : > { %p17_p1 = scmp.ge.s32.totalorder %s20_s17, 4   ;;  %s2493_s13 = smov %s1687_s14 }
 0x1b8   : > { %s2494_s14 = smov %s1778_s24  ;;  %s2495_s15 = smov %s1695_s16 }
 0x1b9   : > { %s2496_s16 = smov %s2498_s18  ;;  %19 = sbr.rel (!%p17_p1) target bundleno = 7 (0x7), region = 102 }
 0x1be   :  { %1226 = vsyncpa [#allocation4], 1 }
 0x1bf   :  { %1228 = vsyncpa [#allocation4 + $0x1], 1 }
 0x1c0   :  { %1229 = vsyncpa [#allocation7], 1 }
 0x1c1   :  { %1231 = vsyncpa [#allocation7 + $0x1], 1 }
 0x1c2   :  { %1232 = vsyncpa [#allocation5], 1 }
 0x1c3   :  { %1234 = vsyncpa [#allocation5 + $0x1], 1 }

</bundles_post_ra>
